<compile_context>
chip_gen: v7x
topology: tpu7x:2x2x1
jax: 0.10.0
libtpu: 0.0.40
codegen_flags: <defaults>
</compile_context>

<pallas_src>
import functools

import jax
import jax.numpy as jnp
from jax.experimental import pallas as pl
from jax.experimental.pallas import tpu as pltpu

IN_DIM = 28 * 28          # 784
H1, H2 = 256, 128
OUT_DIM = 10
OUT_PAD = 128             # last layer padded to full lane width
_ROW_ALIGN = 16           # bf16 native sublane tile is (16, 128)

# Generation-specific defaults (queried once; conservative fallback).
try:
    _VMEM_CAP = int(pltpu.get_tpu_info().vmem_capacity_bytes)
except Exception:                      # no info available -> assume v7x-sized
    _VMEM_CAP = 64 << 20
_VMEM_LIMIT = min(96 << 20, (_VMEM_CAP * 3) // 4)   # ~48 MiB v7x, ~96 MiB v5e/v6e
_DEFAULT_TB = 4096 if _VMEM_CAP >= (96 << 20) else 2048


def _round_up(n, m):
    return ((n + m - 1) // m) * m


def _cdiv(a, b):
    return -(-a // b)


def _choose_tile(b_pad, tb_max):
    """Largest multiple of 16 that divides b_pad and is <= tb_max.

    When the batch is big enough, also force >= 2 grid steps so the
    "parallel" batch axis can be sharded across both TensorCores on v7x.
    """
    def best_divisor(limit):
        best = _ROW_ALIGN
        t = _ROW_ALIGN
        while t <= limit:
            if b_pad % t == 0:
                best = t
            t += _ROW_ALIGN
        return best

    tile = best_divisor(max(_ROW_ALIGN, min(tb_max, b_pad)))
    if b_pad // tile < 2 and b_pad >= 2 * _ROW_ALIGN:
        tile = best_divisor(b_pad // 2)
    return tile


def _plan_batch(B, tb_max):
    """Return (b_pad, tile).

    Prefer a tile that divides the 16-aligned batch exactly (no padded copy
    of x in HBM); only for awkward batch sizes (tiny exact divisor -> per-step
    overhead would dominate this bandwidth-bound kernel) pad the batch up to a
    whole number of full-size tiles (the pad fuses with the bf16 cast).
    """
    tb_max = max(_ROW_ALIGN, (tb_max // _ROW_ALIGN) * _ROW_ALIGN)
    b16 = _round_up(max(B, 1), _ROW_ALIGN)
    tile = _choose_tile(b16, tb_max)
    if tile >= min(256, b16):
        return b16, tile
    steps = max(2, _cdiv(b16, tb_max))
    tile = min(tb_max, _round_up(_cdiv(b16, steps), _ROW_ALIGN))
    return steps * tile, tile


def _resident_spec(shape):
    """Constant block index -> VMEM-resident across the grid; single-buffered
    (no point allocating a second buffer for a block that never changes)."""
    try:
        return pl.BlockSpec(shape, lambda i: (0, 0), pipeline_mode=pl.Buffered(1))
    except (TypeError, AttributeError):      # older BlockSpec signature
        return pl.BlockSpec(shape, lambda i: (0, 0))


def mlp_kernel(x_ref, w1_ref, b1_ref, w2_ref, b2_ref, w3_ref, b3_ref, o_ref):
    # bf16 MXU matmuls with f32 accumulation; bias add + ReLU in f32.
    h1 = jnp.dot(x_ref[...], w1_ref[...], preferred_element_type=jnp.float32)
    h1 = jnp.maximum(h1 + b1_ref[...], 0.0)
    h2 = jnp.dot(h1.astype(jnp.bfloat16), w2_ref[...],
                 preferred_element_type=jnp.float32)
    h2 = jnp.maximum(h2 + b2_ref[...], 0.0)
    o = jnp.dot(h2.astype(jnp.bfloat16), w3_ref[...],
                preferred_element_type=jnp.float32)
    o_ref[...] = (o + b3_ref[...]).astype(o_ref.dtype)


@functools.partial(jax.jit, static_argnames=("tb",))
def simple_nn_forward(x, params, *, tb=None):
    """x: (B, 1, 28, 28), f32 or bf16 (bf16 preferred).  Returns (B, 10) f32."""
    w1, b1, w2, b2, w3, b3 = params
    B = x.shape[0]
    x_flat = x.reshape(B, IN_DIM)                       # nn.Flatten (free reshape)
    if x_flat.dtype != jnp.bfloat16:
        # Halves the dominant HBM stream; fuses with the pad below under jit.
        x_flat = x_flat.astype(jnp.bfloat16)

    tb_max = _DEFAULT_TB if tb is None else tb
    b_pad, tile = _plan_batch(B, tb_max)
    if b_pad != B:
        x_flat = jnp.pad(x_flat, ((0, b_pad - B), (0, 0)))
    grid = (b_pad // tile,)

    flops = 2 * b_pad * (IN_DIM * H1 + H1 * H2 + H2 * OUT_PAD)
    bytes_accessed = (
        x_flat.size * x_flat.dtype.itemsize
        + b_pad * OUT_PAD * 2
        + sum(p.size * p.dtype.itemsize for p in (w1, b1, w2, b2, w3, b3))
    )

    out = pl.pallas_call(
        mlp_kernel,
        out_shape=jax.ShapeDtypeStruct((b_pad, OUT_PAD), jnp.bfloat16),
        grid=grid,
        in_specs=[
            pl.BlockSpec((tile, IN_DIM), lambda i: (i, 0)),   # activation stream
            _resident_spec(w1.shape), _resident_spec(b1.shape),
            _resident_spec(w2.shape), _resident_spec(b2.shape),
            _resident_spec(w3.shape), _resident_spec(b3.shape),
        ],
        out_specs=pl.BlockSpec((tile, OUT_PAD), lambda i: (i, 0)),
        compiler_params=pltpu.CompilerParams(
            dimension_semantics=("parallel",),   # shard batch across v7x's 2 TCs
            vmem_limit_bytes=_VMEM_LIMIT,
        ),
        cost_estimate=pl.CostEstimate(
            flops=flops, transcendentals=0, bytes_accessed=bytes_accessed),
    )(x_flat, w1, b1, w2, b2, w3, b3)

    # Padded rows / lanes are garbage (bias+ReLU); slice them off here.
    return out[:B, :OUT_DIM].astype(jnp.float32)


def init_params(key):
    """Deterministic init mimicking nn.Linear's uniform(-1/sqrt(in), 1/sqrt(in)).

    Weights stored as (in, out) bf16; biases (1, out) f32.  Layer 3 is
    zero-padded from 10 to 128 output lanes.
    """
    dims = [(IN_DIM, H1), (H1, H2), (H2, OUT_DIM)]
    params = []
    for i, (fan_in, fan_out) in enumerate(dims):
        kw, kb = jax.random.split(jax.random.fold_in(key, i))
        bound = 1.0 / (fan_in ** 0.5)
        w = jax.random.uniform(kw, (fan_in, fan_out), jnp.float32, -bound, bound)
        b = jax.random.uniform(kb, (1, fan_out), jnp.float32, -bound, bound)
        if i == 2:  # pad final layer to lane width 128 (unmasked stores)
            w = jnp.pad(w, ((0, 0), (0, OUT_PAD - fan_out)))
            b = jnp.pad(b, ((0, 0), (0, OUT_PAD - fan_out)))
        params += [w.astype(jnp.bfloat16), b]
    return tuple(params)


def reference_forward(x, params):
    """f32 reference using the same (bf16-stored) weight values.

    Note: the kernel uses bf16 activations / bf16 logit writeback (f32
    accumulation), so the comparison uses a loosened tolerance.
    """
    w1, b1, w2, b2, w3, b3 = params
    h = x.reshape(x.shape[0], -1).astype(jnp.float32)
    h = jnp.maximum(h @ w1.astype(jnp.float32) + b1, 0.0)
    h = jnp.maximum(h @ w2.astype(jnp.float32) + b2, 0.0)
    return (h @ w3.astype(jnp.float32) + b3)[:, :OUT_DIM]


if __name__ == "__main__":
    key = jax.random.PRNGKey(0)
    kx, kp = jax.random.split(key)
    B = 8
    x = jax.random.normal(kx, (B, 1, 28, 28), dtype=jnp.float32)
    params = init_params(kp)

    out = simple_nn_forward(x, params)
    out = jax.block_until_ready(out)

    ref = reference_forward(x, params)
    assert out.shape == (B, OUT_DIM)
    assert out.dtype == jnp.float32
    # bf16 matmul operands + bf16 logit writeback -> loosened tolerance.
    assert jnp.allclose(out, ref, atol=5e-2, rtol=5e-2)
    print("KERNEL_OK")
</pallas_src>

<mosaic_0001>
module attributes {stable_mosaic.version = 11 : i64} {
  func.func @mlp_kernel(%arg0: i32, %arg1: memref<16x784xbf16, #tpu.memory_space<vmem>>, %arg2: memref<784x256xbf16, #tpu.memory_space<vmem>>, %arg3: memref<1x256xf32, #tpu.memory_space<vmem>>, %arg4: memref<256x128xbf16, #tpu.memory_space<vmem>>, %arg5: memref<1x128xf32, #tpu.memory_space<vmem>>, %arg6: memref<128x128xbf16, #tpu.memory_space<vmem>>, %arg7: memref<1x128xf32, #tpu.memory_space<vmem>>, %arg8: memref<16x128xbf16, #tpu.memory_space<vmem>>) attributes {dimension_semantics = [#tpu.dimension_semantics<parallel>], iteration_bounds = array<i64: 1>, scalar_prefetch = 0 : i64, scratch_operands = 0 : i64, tpu.core_type = #tpu.core_type<tc>, window_params = [{transform_indices = @transform_0, window_bounds = array<i64: 16, 784>}, {pipeline_mode = #tpu.pipeline_mode<synchronous>, transform_indices = @transform_1, window_bounds = array<i64: 784, 256>}, {pipeline_mode = #tpu.pipeline_mode<synchronous>, transform_indices = @transform_2, window_bounds = array<i64: 1, 256>}, {pipeline_mode = #tpu.pipeline_mode<synchronous>, transform_indices = @transform_3, window_bounds = array<i64: 256, 128>}, {pipeline_mode = #tpu.pipeline_mode<synchronous>, transform_indices = @transform_4, window_bounds = array<i64: 1, 128>}, {pipeline_mode = #tpu.pipeline_mode<synchronous>, transform_indices = @transform_5, window_bounds = array<i64: 128, 128>}, {pipeline_mode = #tpu.pipeline_mode<synchronous>, transform_indices = @transform_6, window_bounds = array<i64: 1, 128>}, {transform_indices = @transform_7, window_bounds = array<i64: 16, 128>}]} {
    %c0 = arith.constant 0 : index
    %c0_0 = arith.constant 0 : index
    %0 = vector.load %arg1[%c0, %c0_0] : memref<16x784xbf16, #tpu.memory_space<vmem>>, vector<16x784xbf16>
    %c0_1 = arith.constant 0 : index
    %c0_2 = arith.constant 0 : index
    %1 = vector.load %arg2[%c0_1, %c0_2] : memref<784x256xbf16, #tpu.memory_space<vmem>>, vector<784x256xbf16>
    %cst = arith.constant dense<0.000000e+00> : vector<16x256xf32>
    %2 = tpu.matmul %0, %1, %cst {dimension_numbers = #tpu.dot_dimension_numbers<[1], [0], [0], [1], [0, 0, 1, 1], [], []>} : vector<16x784xbf16>, vector<784x256xbf16>, vector<16x256xf32> -> vector<16x256xf32>
    %c0_3 = arith.constant 0 : index
    %c0_4 = arith.constant 0 : index
    %3 = vector.load %arg3[%c0_3, %c0_4] : memref<1x256xf32, #tpu.memory_space<vmem>>, vector<1x256xf32>
    %4 = vector.broadcast %3 : vector<1x256xf32> to vector<16x256xf32>
    %5 = arith.addf %2, %4 : vector<16x256xf32>
    %cst_5 = arith.constant 0.000000e+00 : f32
    %6 = vector.broadcast %cst_5 : f32 to vector<16x256xf32>
    %7 = arith.maximumf %5, %6 : vector<16x256xf32>
    %8 = arith.truncf %7 : vector<16x256xf32> to vector<16x256xbf16>
    %c0_6 = arith.constant 0 : index
    %c0_7 = arith.constant 0 : index
    %9 = vector.load %arg4[%c0_6, %c0_7] : memref<256x128xbf16, #tpu.memory_space<vmem>>, vector<256x128xbf16>
    %cst_8 = arith.constant dense<0.000000e+00> : vector<16x128xf32>
    %10 = tpu.matmul %8, %9, %cst_8 {dimension_numbers = #tpu.dot_dimension_numbers<[1], [0], [0], [1], [0, 0, 1, 1], [], []>} : vector<16x256xbf16>, vector<256x128xbf16>, vector<16x128xf32> -> vector<16x128xf32>
    %c0_9 = arith.constant 0 : index
    %c0_10 = arith.constant 0 : index
    %11 = vector.load %arg5[%c0_9, %c0_10] : memref<1x128xf32, #tpu.memory_space<vmem>>, vector<1x128xf32>
    %12 = vector.broadcast %11 : vector<1x128xf32> to vector<16x128xf32>
    %13 = arith.addf %10, %12 : vector<16x128xf32>
    %cst_11 = arith.constant 0.000000e+00 : f32
    %14 = vector.broadcast %cst_11 : f32 to vector<16x128xf32>
    %15 = arith.maximumf %13, %14 : vector<16x128xf32>
    %16 = arith.truncf %15 : vector<16x128xf32> to vector<16x128xbf16>
    %c0_12 = arith.constant 0 : index
    %c0_13 = arith.constant 0 : index
    %17 = vector.load %arg6[%c0_12, %c0_13] : memref<128x128xbf16, #tpu.memory_space<vmem>>, vector<128x128xbf16>
    %cst_14 = arith.constant dense<0.000000e+00> : vector<16x128xf32>
    %18 = tpu.matmul %16, %17, %cst_14 {dimension_numbers = #tpu.dot_dimension_numbers<[1], [0], [0], [1], [0, 0, 1, 1], [], []>} : vector<16x128xbf16>, vector<128x128xbf16>, vector<16x128xf32> -> vector<16x128xf32>
    %c0_15 = arith.constant 0 : index
    %c0_16 = arith.constant 0 : index
    %19 = vector.load %arg7[%c0_15, %c0_16] : memref<1x128xf32, #tpu.memory_space<vmem>>, vector<1x128xf32>
    %20 = vector.broadcast %19 : vector<1x128xf32> to vector<16x128xf32>
    %21 = arith.addf %18, %20 : vector<16x128xf32>
    %22 = arith.truncf %21 : vector<16x128xf32> to vector<16x128xbf16>
    %c0_17 = arith.constant 0 : index
    %c0_18 = arith.constant 0 : index
    %23 = vector.load %arg8[%c0_17, %c0_18] : memref<16x128xbf16, #tpu.memory_space<vmem>>, vector<16x128xbf16>
    tpu.vector_store %arg8[%c0_17, %c0_18], %22 {strides = array<i32>} : memref<16x128xbf16, #tpu.memory_space<vmem>>, vector<16x128xbf16>,
    return
  }
  func.func @transform_0(%arg0: i32) -> (i32, i32) {
    %c0_i32 = arith.constant 0 : i32
    %c0_i32_0 = arith.constant 0 : i32
    return %arg0, %c0_i32 : i32, i32
  }
  func.func @transform_1(%arg0: i32) -> (i32, i32) {
    %c0_i32 = arith.constant 0 : i32
    %c0_i32_0 = arith.constant 0 : i32
    %c0_i32_1 = arith.constant 0 : i32
    return %c0_i32, %c0_i32_0 : i32, i32
  }
  func.func @transform_2(%arg0: i32) -> (i32, i32) {
    %c0_i32 = arith.constant 0 : i32
    %c0_i32_0 = arith.constant 0 : i32
    %c0_i32_1 = arith.constant 0 : i32
    return %c0_i32, %c0_i32_0 : i32, i32
  }
  func.func @transform_3(%arg0: i32) -> (i32, i32) {
    %c0_i32 = arith.constant 0 : i32
    %c0_i32_0 = arith.constant 0 : i32
    %c0_i32_1 = arith.constant 0 : i32
    return %c0_i32, %c0_i32_0 : i32, i32
  }
  func.func @transform_4(%arg0: i32) -> (i32, i32) {
    %c0_i32 = arith.constant 0 : i32
    %c0_i32_0 = arith.constant 0 : i32
    %c0_i32_1 = arith.constant 0 : i32
    return %c0_i32, %c0_i32_0 : i32, i32
  }
  func.func @transform_5(%arg0: i32) -> (i32, i32) {
    %c0_i32 = arith.constant 0 : i32
    %c0_i32_0 = arith.constant 0 : i32
    %c0_i32_1 = arith.constant 0 : i32
    return %c0_i32, %c0_i32_0 : i32, i32
  }
  func.func @transform_6(%arg0: i32) -> (i32, i32) {
    %c0_i32 = arith.constant 0 : i32
    %c0_i32_0 = arith.constant 0 : i32
    %c0_i32_1 = arith.constant 0 : i32
    return %c0_i32, %c0_i32_0 : i32, i32
  }
  func.func @transform_7(%arg0: i32) -> (i32, i32) {
    %c0_i32 = arith.constant 0 : i32
    %c0_i32_0 = arith.constant 0 : i32
    return %arg0, %c0_i32 : i32, i32
  }
}

</mosaic_0001>

<bundles_post_ra>
// kernel: simple_nn_forward.1
= control target key start
LH: loop header
LB: loop body
LE: loop exit
PB: predicated region body
PF: predicated region fallthrough
CT: control target
= control target key end

     0   :  { %12 = vsyncpa [#allocation3], 0  ;;  %s1591_s24 = smov [#allocation2]   ;;  %s1754_s0 = inlined_call_operand.vmem [shape: bf16[16,784], index: 0, kind: input, shape index: {}]   ;;  %s1755_s1 = inlined_call_operand.hbm [shape: bf16[784,256], index: 1, kind: input, shape index: {}]   ;;  %s1756_s2 = inlined_call_operand.vmem [shape: f32[1,256], index: 2, kind: input, shape index: {}]   ;;  %s1757_s3 = inlined_call_operand.vmem [shape: bf16[256,128], index: 3, kind: input, shape index: {}]   ;;  %s1758_s4 = inlined_call_operand.vmem [shape: f32[1,128], index: 4, kind: input, shape index: {}]   ;;  %s1759_s5 = inlined_call_operand.vmem [shape: bf16[128,128], index: 5, kind: input, shape index: {}]   ;;  %s1760_s6 = inlined_call_operand.vmem [shape: f32[1,128], index: 6, kind: input, shape index: {}]   ;;  %s1761_s7 = inlined_call_operand.vmem [shape: bf16[16,128], index: 7, kind: output, shape index: {}]  }
   0x1   :  { %s20_s25 = sshll.u32 %s1591_s24, 4  ;;  %s1567_s28 = scalar_lea.hbm %s1755_s1, 12544  ;;  %s21_s25 = int_to_ptr.vmem [resolvable:$true] %s20_s25 }
   0x2   :  { %p1568_p0 = scmp.ne.s32.totalorder %s1755_s1, %s1567_s28  ;;  %p1571_p1 = scmp.lt.u32.totalorder %s1567_s28, %s1755_s1 }
   0x4   :  { %p1573_p2 = pnand %p1571_p1, %p1568_p0 }
   0x6   :  { %1576 = shalt.err (!%p1573_p2)
}
   0x7   :  { %s1577_s10 = scalar_lea.vmem %s21_s25, 12544  ;;  %p1582_p4 = scmp.lt.s32.totalorder %s21_s25, %s21_s25 }
   0x8   :  { %p1578_p3 = scmp.ne.s32.totalorder %s21_s25, %s1577_s10  ;;  %p1583_p5 = scmp.lt.s32.totalorder %s1577_s10, %s1577_s10 }
   0xa   :  { %p1584_p6 = por %p1583_p5, %p1582_p4 }
   0xc   :  { %p1585_p7 = pnand %p1584_p6, %p1578_p3 }
   0xe   :  { %1588 = shalt.err (!%p1585_p7)
}
   0xf   :  { %s1592_s11 = smov 128   ;;  %s1593_s12 = smov 8  }
  0x10   :  { %26 = dma.hbm_to_vmem [thread:$0]  %s1755_s1, 12544, %s21_s25, [#allocation3], %s1592_s11, %s1592_s11, %s1593_s12  }
  0x11   :  { %1589 = dma.done.wait [#allocation3], 12544  }
  0x12   :  { %1590 = vsyncadd [#allocation3], 4294954752  ;;  %v1386_v0 = vld [vmem:[#allocation2 + $0x104] ss:$8 sps:$4 sm:$0xff]   ;;  %v1388_v1 = vld [vmem:[#allocation2 + $0x100] ss:$8 sps:$4 sm:$0xff]  }
  0x13   :  { %731 = vmatprep.subr.bf16.mxu0 %v1386_v0  ;;  %v1389_v2 = vld [vmem:[#allocation2 + $0x114] ss:$8 sps:$4 sm:$0xff]   ;;  %v1391_v3 = vld [vmem:[#allocation2 + $0x110] ss:$8 sps:$4 sm:$0xff]   ;;  %v1392_v4 = vld [vmem:[#allocation2 + $0x124] ss:$8 sps:$4 sm:$0xff]  }
  0x14   :  { %732 = vmatpush1.bf16.msra.mxu0 %v1388_v1  ;;  %v1394_v5 = vld [vmem:[#allocation2 + $0x120] ss:$8 sps:$4 sm:$0xff]   ;;  %v1395_v6 = vld [vmem:[#allocation2 + $0x134] ss:$8 sps:$4 sm:$0xff]   ;;  %v1397_v7 = vld [vmem:[#allocation2 + $0x130] ss:$8 sps:$4 sm:$0xff]  }
  0x15   :  { %733 = vmatprep.subr.bf16.mxu0 %v1389_v2  ;;  %v1398_v8 = vld [vmem:[#allocation2 + $0x144] ss:$8 sps:$4 sm:$0xff]   ;;  %v1400_v9 = vld [vmem:[#allocation2 + $0x140] ss:$8 sps:$4 sm:$0xff]   ;;  %v1401_v10 = vld [vmem:[#allocation2 + $0x154] ss:$8 sps:$4 sm:$0xff]  }
  0x16   :  { %v1403_v11 = vld [vmem:[#allocation2 + $0x150] ss:$8 sps:$4 sm:$0xff]   ;;  %v1404_v12 = vld [vmem:[#allocation2 + $0x164] ss:$8 sps:$4 sm:$0xff]   ;;  %v1406_v14 = vld [vmem:[#allocation2 + $0x160] ss:$8 sps:$4 sm:$0xff]  }
  0x17   :  { %v1436_v13 = vld [vmem:[%s1754_s0 + $0xc] ss:$28 sps:$4 sm:$0xff]   ;;  %v1407_v15 = vld [vmem:[#allocation2 + $0x174] ss:$8 sps:$4 sm:$0xff]   ;;  %v1409_v17 = vld [vmem:[#allocation2 + $0x170] ss:$8 sps:$4 sm:$0xff]  }
  0x18   :  { %734 = vmatpush1.bf16.msra.mxu0 %v1391_v3  ;;  %763 = vmatprep.mubr.bf16.mxu0 %v1436_v13  ;;  %v1443_v16 = vld [vmem:[#allocation2 + $0x4] ss:$8 sps:$4 sm:$0xff]   ;;  %v1448_v19 = vld [vmem:[#allocation2] ss:$8 sps:$4 sm:$0xff]   ;;  %v1449_v20 = vld [vmem:[#allocation2 + $0x14] ss:$8 sps:$4 sm:$0xff]  }
  0x19   :  { %735 = vmatprep.subr.bf16.mxu0 %v1392_v4  ;;  %v1410_v18 = vld [vmem:[#allocation2 + $0x184] ss:$8 sps:$4 sm:$0xff]   ;;  %688 = vmatprep.subr.bf16.mxu1 %v1443_v16  ;;  %v1412_v21 = vld [vmem:[#allocation2 + $0x180] ss:$8 sps:$4 sm:$0xff]   ;;  %v1454_v22 = vld [vmem:[#allocation2 + $0x10] ss:$8 sps:$4 sm:$0xff]  }
  0x1a   :  { %689 = vmatpush1.bf16.msra.mxu1 %v1448_v19  ;;  %v1455_v23 = vld [vmem:[#allocation2 + $0x24] ss:$8 sps:$4 sm:$0xff]   ;;  %v1413_v24 = vld [vmem:[#allocation2 + $0x194] ss:$8 sps:$4 sm:$0xff]   ;;  %v1460_v25 = vld [vmem:[#allocation2 + $0x20] ss:$8 sps:$4 sm:$0xff]  }
  0x1b   :  { %690 = vmatprep.subr.bf16.mxu1 %v1449_v20  ;;  %v1461_v26 = vld [vmem:[#allocation2 + $0x34] ss:$8 sps:$4 sm:$0xff]   ;;  %v1415_v27 = vld [vmem:[#allocation2 + $0x190] ss:$8 sps:$4 sm:$0xff]   ;;  %v1416_v28 = vld [vmem:[#allocation2 + $0x1a4] ss:$8 sps:$4 sm:$0xff]  }
  0x1c   :  { %736 = vmatpush1.bf16.msra.mxu0 %v1394_v5  ;;  %v1466_v29 = vld [vmem:[#allocation2 + $0x30] ss:$8 sps:$4 sm:$0xff]   ;;  %v1467_v30 = vld [vmem:[#allocation2 + $0x44] ss:$8 sps:$4 sm:$0xff]   ;;  %v1418_v31 = vld [vmem:[#allocation2 + $0x1a0] ss:$8 sps:$4 sm:$0xff]  }
  0x1d   :  { %737 = vmatprep.subr.bf16.mxu0 %v1395_v6  ;;  %v1419_v32 = vld [vmem:[#allocation2 + $0x1b4] ss:$8 sps:$4 sm:$0xff]   ;;  %v1472_v33 = vld [vmem:[#allocation2 + $0x40] ss:$8 sps:$4 sm:$0xff]   ;;  %v1421_v35 = vld [vmem:[#allocation2 + $0x1b0] ss:$8 sps:$4 sm:$0xff]  }
  0x1e   :  { %691 = vmatpush1.bf16.msra.mxu1 %v1454_v22  ;;  %v1473_v34 = vld [vmem:[#allocation2 + $0x54] ss:$8 sps:$4 sm:$0xff]   ;;  %v1422_v36 = vld [vmem:[#allocation2 + $0x1c4] ss:$8 sps:$4 sm:$0xff]   ;;  %v1478_v37 = vld [vmem:[#allocation2 + $0x50] ss:$8 sps:$4 sm:$0xff]  }
  0x1f   :  { %692 = vmatprep.subr.bf16.mxu1 %v1455_v23  ;;  %v1479_v38 = vld [vmem:[#allocation2 + $0x64] ss:$8 sps:$4 sm:$0xff]   ;;  %v1424_v39 = vld [vmem:[#allocation2 + $0x1c0] ss:$8 sps:$4 sm:$0xff]   ;;  %v1425_v40 = vld [vmem:[#allocation2 + $0x1d4] ss:$8 sps:$4 sm:$0xff]  }
  0x20   :  { %738 = vmatpush1.bf16.msra.mxu0 %v1397_v7  ;;  %v1484_v41 = vld [vmem:[#allocation2 + $0x60] ss:$8 sps:$4 sm:$0xff]   ;;  %v1485_v42 = vld [vmem:[#allocation2 + $0x74] ss:$8 sps:$4 sm:$0xff]   ;;  %v1427_v43 = vld [vmem:[#allocation2 + $0x1d0] ss:$8 sps:$4 sm:$0xff]  }
  0x21   :  { %739 = vmatprep.subr.bf16.mxu0 %v1398_v8  ;;  %v1428_v44 = vld [vmem:[#allocation2 + $0x1e4] ss:$8 sps:$4 sm:$0xff]   ;;  %v1490_v45 = vld [vmem:[#allocation2 + $0x70] ss:$8 sps:$4 sm:$0xff]   ;;  %v1430_v47 = vld [vmem:[#allocation2 + $0x1e0] ss:$8 sps:$4 sm:$0xff]  }
  0x22   :  { %693 = vmatpush1.bf16.msra.mxu1 %v1460_v25  ;;  %v1491_v46 = vld [vmem:[#allocation2 + $0x84] ss:$8 sps:$4 sm:$0xff]   ;;  %v1431_v48 = vld [vmem:[#allocation2 + $0x1f4] ss:$8 sps:$4 sm:$0xff]   ;;  %v1496_v49 = vld [vmem:[#allocation2 + $0x80] ss:$8 sps:$4 sm:$0xff]  }
  0x23   :  { %694 = vmatprep.subr.bf16.mxu1 %v1461_v26  ;;  %v1497_v50 = vld [vmem:[#allocation2 + $0x94] ss:$8 sps:$4 sm:$0xff]   ;;  %v1433_v51 = vld [vmem:[#allocation2 + $0x1f0] ss:$8 sps:$4 sm:$0xff]   ;;  %v1439_v52 = vld [vmem:[#allocation2 + $0x204] ss:$8 sps:$4 sm:$0xff]  }
  0x24   :  { %740 = vmatpush1.bf16.msra.mxu0 %v1400_v9  ;;  %v1502_v53 = vld [vmem:[#allocation2 + $0x90] ss:$8 sps:$4 sm:$0xff]   ;;  %v1434_v54 = vld [vmem:[%s1754_s0 + $0x8] ss:$28 sps:$4 sm:$0xff]   ;;  %v1442_v58 = vld [vmem:[#allocation2 + $0x214] ss:$8 sps:$4 sm:$0xff]  }
  0x25   :  { %741 = vmatprep.subr.bf16.mxu0 %v1401_v10  ;;  %v1503_v55 = vld [vmem:[#allocation2 + $0xa4] ss:$8 sps:$4 sm:$0xff]   ;;  %v1437_v56 = vld [vmem:[#allocation2 + $0x200] ss:$8 sps:$4 sm:$0xff]   ;;  %v1529_v57 = vld [vmem:[%s1754_s0 + $0x14] ss:$28 sps:$4 sm:$0xff]  }
  0x26   :  { %695 = vmatpush1.bf16.msra.mxu1 %v1466_v29  ;;  %v1508_v59 = vld [vmem:[#allocation2 + $0xa0] ss:$8 sps:$4 sm:$0xff]   ;;  %v1509_v60 = vld [vmem:[#allocation2 + $0xb4] ss:$8 sps:$4 sm:$0xff]   ;;  %v1440_v61 = vld [vmem:[#allocation2 + $0x210] ss:$8 sps:$4 sm:$0xff]  }
  0x27   :  { %696 = vmatprep.subr.bf16.mxu1 %v1467_v30  ;;  %v1447_v62 = vld [vmem:[#allocation2 + $0x224] ss:$8 sps:$4 sm:$0xff]   ;;  %v1514_v63 = vld [vmem:[#allocation2 + $0xb0] ss:$8 sps:$4 sm:$0xff]   ;;  %v1445_v2 = vld [vmem:[#allocation2 + $0x220] ss:$8 sps:$4 sm:$0xff]  }
  0x28   :  { %742 = vmatpush1.bf16.msra.mxu0 %v1403_v11  ;;  %v1541_v0 = vld [vmem:[%s1754_s0 + $0x4] ss:$28 sps:$4 sm:$0xff]   ;;  %v1453_v3 = vld [vmem:[#allocation2 + $0x234] ss:$8 sps:$4 sm:$0xff]   ;;  %v1451_v6 = vld [vmem:[#allocation2 + $0x230] ss:$8 sps:$4 sm:$0xff]  }
  0x29   :  { %743 = vmatprep.subr.bf16.mxu0 %v1404_v12  ;;  %v1515_v1 = vld [vmem:[#allocation2 + $0xc4] ss:$8 sps:$4 sm:$0xff]   ;;  %720 = vmatprep.mubr.bf16.mxu1 %v1541_v0  ;;  %v1520_v4 = vld [vmem:[#allocation2 + $0xc0] ss:$8 sps:$4 sm:$0xff]   ;;  %v1521_v5 = vld [vmem:[#allocation2 + $0xd4] ss:$8 sps:$4 sm:$0xff]  }
  0x2a   :  { %697 = vmatpush1.bf16.msra.mxu1 %v1472_v33  ;;  %v1459_v7 = vld [vmem:[#allocation2 + $0x244] ss:$8 sps:$4 sm:$0xff]   ;;  %v1457_v8 = vld [vmem:[#allocation2 + $0x240] ss:$8 sps:$4 sm:$0xff]   ;;  %v1526_v9 = vld [vmem:[#allocation2 + $0xd0] ss:$8 sps:$4 sm:$0xff]  }
  0x2b   :  { %698 = vmatprep.subr.bf16.mxu1 %v1473_v34  ;;  %v1530_v10 = vld [vmem:[#allocation2 + $0xe4] ss:$8 sps:$4 sm:$0xff]   ;;  %v1465_v11 = vld [vmem:[#allocation2 + $0x254] ss:$8 sps:$4 sm:$0xff]   ;;  %v1535_v12 = vld [vmem:[#allocation2 + $0xe0] ss:$8 sps:$4 sm:$0xff]  }
  0x2c   :  { %744 = vmatpush1.bf16.msra.mxu0 %v1406_v14  ;;  %v1536_v13 = vld [vmem:[#allocation2 + $0xf4] ss:$8 sps:$4 sm:$0xff]   ;;  %v1463_v14 = vld [vmem:[#allocation2 + $0x250] ss:$8 sps:$4 sm:$0xff]   ;;  %v1545_v22 = vld [vmem:[%s1757_s3 + $0x48] sm:$0xff]   ;;  %vm684_vm0 = vcmask 130048  }
  0x2d   :  { %745 = vmatprep.subr.bf16.mxu0 %v1407_v15  ;;  %v1471_v15 = vld [vmem:[#allocation2 + $0x264] ss:$8 sps:$4 sm:$0xff]   ;;  %v1538_v16 = vld [vmem:[#allocation2 + $0xf0] ss:$8 sps:$4 sm:$0xff]   ;;  %v1477_v19 = vld [vmem:[#allocation2 + $0x274] ss:$8 sps:$4 sm:$0xff]  }
  0x2e   :  { %699 = vmatpush1.bf16.msra.mxu1 %v1478_v37  ;;  %v1539_v20 = vld [vmem:[%s1754_s0] ss:$28 sps:$4 sm:$0xff]   ;;  %v1475_v23 = vld [vmem:[#allocation2 + $0x270] ss:$8 sps:$4 sm:$0xff]   ;;  %v1546_v25 = vld [vmem:[%s1757_s3 + $0x8] sm:$0xff]   ;;  %vm1596_vm1 = vmmov 0  }
  0x2f   :  { %700 = vmatprep.subr.bf16.mxu1 %v1479_v38  ;;  %v1547_v26 = vld [vmem:[%s1757_s3 + $0x50] sm:$0xff]   ;;  %v1549_v30 = vld [vmem:[%s1757_s3 + $0x58] sm:$0xff]   ;;  %v1551_v34 = vld [vmem:[%s1757_s3 + $0x60] sm:$0xff]  }
  0x30   :  { %746 = vmatpush1.bf16.msra.mxu0 %v1409_v17  ;;  %v1543_v17 = vld [vmem:[%s1757_s3 + $0x40] sm:$0xff]   ;;  %v1548_v29 = vld [vmem:[%s1757_s3 + $0x10] sm:$0xff]   ;;  %v1550_v33 = vld [vmem:[%s1757_s3 + $0x18] sm:$0xff]  }
  0x31   :  { %747 = vmatprep.subr.bf16.mxu0 %v1410_v18  ;;  %v1469_v18 = vld [vmem:[#allocation2 + $0x260] ss:$8 sps:$4 sm:$0xff]   ;;  %v1499_v37 = vld [vmem:[#allocation2 + $0x2b0] ss:$8 sps:$4 sm:$0xff]   ;;  %v1507_v38 = vld [vmem:[#allocation2 + $0x2c4] ss:$8 sps:$4 sm:$0xff]  }
  0x32   :  { %701 = vmatpush1.bf16.msra.mxu1 %v1484_v41  ;;  %v1511_v41 = vld [vmem:[#allocation2 + $0x2d0] ss:$8 sps:$4 sm:$0xff]  }
  0x33   :  { %702 = vmatprep.subr.bf16.mxu1 %v1485_v42  ;;  %v1519_v42 = vld [vmem:[#allocation2 + $0x2e4] ss:$8 sps:$4 sm:$0xff]  }
  0x34   :  { %748 = vmatpush1.bf16.msra.mxu0 %v1412_v21  ;;  %v1544_v21 = vld [vmem:[%s1757_s3] sm:$0xff]  }
  0x35   :  { %749 = vmatprep.subr.bf16.mxu0 %v1413_v24  ;;  %v1483_v24 = vld [vmem:[#allocation2 + $0x284] ss:$8 sps:$4 sm:$0xff]  }
  0x36   :  { %703 = vmatpush1.bf16.msra.mxu1 %v1490_v45  ;;  %v1523_v45 = vld [vmem:[#allocation2 + $0x2f0] ss:$8 sps:$4 sm:$0xff]  }
  0x37   :  { %704 = vmatprep.subr.bf16.mxu1 %v1491_v46  ;;  %v1534_v46 = vld [vmem:[#allocation2 + $0x304] ss:$8 sps:$4 sm:$0xff]  }
  0x38   :  { %750 = vmatpush1.bf16.msra.mxu0 %v1415_v27  ;;  %v1481_v27 = vld [vmem:[#allocation2 + $0x280] ss:$8 sps:$4 sm:$0xff]  }
  0x39   :  { %751 = vmatprep.subr.bf16.mxu0 %v1416_v28  ;;  %v1489_v28 = vld [vmem:[#allocation2 + $0x294] ss:$8 sps:$4 sm:$0xff]  }
  0x3a   :  { %705 = vmatpush1.bf16.msra.mxu1 %v1496_v49  ;;  %v1594_v49 = vmov 0  }
  0x3b   :  { %706 = vmatprep.subr.bf16.mxu1 %v1497_v50  ;;  %v1542_v50 = vld [vmem:[%s1754_s0 + $0x18] ss:$28 sps:$4 sm:$0xff]  }
  0x3c   :  { %752 = vmatpush1.bf16.msra.mxu0 %v1418_v31  ;;  %v1487_v31 = vld [vmem:[#allocation2 + $0x290] ss:$8 sps:$4 sm:$0xff]  }
  0x3d   :  { %753 = vmatprep.subr.bf16.mxu0 %v1419_v32  ;;  %v1495_v32 = vld [vmem:[#allocation2 + $0x2a4] ss:$8 sps:$4 sm:$0xff]  }
  0x3e   :  { %707 = vmatpush1.bf16.msra.mxu1 %v1502_v53  ;;  %v1554_v53 = vld [vmem:[%s1757_s3 + $0x28] sm:$0xff]  }
  0x3f   :  { %708 = vmatprep.subr.bf16.mxu1 %v1503_v55  ;;  %v1556_v55 = vld [vmem:[%s1757_s3 + $0x30] sm:$0xff]  }
  0x40   :  { %754 = vmatpush1.bf16.msra.mxu0 %v1421_v35  ;;  %v1493_v35 = vld [vmem:[#allocation2 + $0x2a0] ss:$8 sps:$4 sm:$0xff]  }
  0x41   :  { %755 = vmatprep.subr.bf16.mxu0 %v1422_v36  ;;  %v1501_v36 = vld [vmem:[#allocation2 + $0x2b4] ss:$8 sps:$4 sm:$0xff]  }
  0x42   :  { %709 = vmatpush1.bf16.msra.mxu1 %v1508_v59 }
  0x43   :  { %710 = vmatprep.subr.bf16.mxu1 %v1509_v60 }
  0x44   :  { %756 = vmatpush1.bf16.msra.mxu0 %v1424_v39  ;;  %v1505_v39 = vld [vmem:[#allocation2 + $0x2c0] ss:$8 sps:$4 sm:$0xff]  }
  0x45   :  { %757 = vmatprep.subr.bf16.mxu0 %v1425_v40  ;;  %v1513_v40 = vld [vmem:[#allocation2 + $0x2d4] ss:$8 sps:$4 sm:$0xff]  }
  0x46   :  { %711 = vmatpush1.bf16.msra.mxu1 %v1514_v63  ;;  %v149_v63 = vlaneseq }
  0x47   :  { %712 = vmatprep.subr.bf16.mxu1 %v1515_v1 }
  0x48   :  { %758 = vmatpush1.bf16.msra.mxu0 %v1427_v43  ;;  %v1517_v43 = vld [vmem:[#allocation2 + $0x2e0] ss:$8 sps:$4 sm:$0xff]   ;;  %v150_v0 = vshrl.u32 %v149_v63, 7 }
  0x49   :  { %759 = vmatprep.subr.bf16.mxu0 %v1428_v44  ;;  %v1525_v44 = vld [vmem:[#allocation2 + $0x2f4] ss:$8 sps:$4 sm:$0xff]  }
  0x4a   :  { %713 = vmatpush1.bf16.msra.mxu1 %v1520_v4  ;;  %v151_v1 = vsub.s32 0, %v150_v0 }
  0x4b   :  { %714 = vmatprep.subr.bf16.mxu1 %v1521_v5 }
  0x4c   :  { %760 = vmatpush1.bf16.msra.mxu0 %v1430_v47  ;;  %v1527_v47 = vld [vmem:[%s1754_s0 + $0x10] ss:$28 sps:$4 sm:$0xff]  }
  0x4d   :  { %761 = vmatprep.subr.bf16.mxu0 %v1431_v48  ;;  %v1532_v48 = vld [vmem:[#allocation2 + $0x300] ss:$8 sps:$4 sm:$0xff]  }
  0x4e   :  { %715 = vmatpush1.bf16.msra.mxu1 %v1526_v9 }
  0x4f   :  { %716 = vmatprep.subr.bf16.mxu1 %v1530_v10 }
  0x50   :  { %762 = vmatpush1.bf16.msra.mxu0 %v1433_v51  ;;  %v1552_v51 = vld [vmem:[%s1757_s3 + $0x20] sm:$0xff]  }
  0x51   :  { %774 = vmatprep.subr.bf16.mxu0 %v1439_v52  ;;  %v1553_v52 = vld [vmem:[%s1757_s3 + $0x68] sm:$0xff]  }
  0x52   :  { %717 = vmatpush1.bf16.msra.mxu1 %v1535_v12 }
  0x53   :  { %764 = vmatmul.mubr.bf16.vlgmr.msra.gmra.mrb[0].mxu0 %v1434_v54  ;;  %718 = vmatprep.subr.bf16.mxu1 %v1536_v13  ;;  %v1555_v54 = vld [vmem:[%s1757_s3 + $0x70] sm:$0xff]  }
  0x54   :  { %775 = vmatpush1.bf16.msra.mxu0 %v1437_v56  ;;  %806 = vmatprep.mubr.bf16.mxu0 %v1529_v57  ;;  %v1557_v56 = vld [vmem:[%s1757_s3 + $0x78] sm:$0xff]  }
  0x55   :  { %776 = vmatprep.subr.bf16.mxu0 %v1442_v58  ;;  %v1558_v57 = vld [vmem:[%s1757_s3 + $0x38] sm:$0xff]   ;;  %v1595_v58 = vmov 0.0  }
  0x56   :  { %719 = vmatpush1.bf16.msra.mxu1 %v1538_v16 }
  0x57   :  { %1313 = vmatprep.subr.bf16.mxu1 %v1543_v17 }
  0x58   :  { %777 = vmatpush1.bf16.msra.mxu0 %v1440_v61 }
  0x59   :  { %778 = vmatprep.subr.bf16.mxu0 %v1447_v62  ;;  %721 = vmatmul.mubr.bf16.vlgmr.msra.gmra.mrb[0].mxu1 %v1539_v20 }
  0x5a   :  { %1314 = vmatpush3.bf16.msra.mxu1 %v1544_v21 }
  0x5b   :  { %1315 = vmatprep.subr.bf16.mxu1 %v1545_v22 }
  0x5c   :  { %779 = vmatpush1.bf16.msra.mxu0 %v1445_v2  ;;  %v147_v2 = vld [vmem:[%s1756_s2] sm:$0x3] }
  0x5d   :  { %780 = vmatprep.subr.bf16.mxu0 %v1453_v3  ;;  %v155_v3 = vsub.s32 1, %v150_v0  ;;  %v152_v4 = vrot.slane %v147_v2, %v151_v1 }
  0x5e   :  { %1316 = vmatpush3.bf16.msra.mxu1 %v1546_v25  ;;  %v1560_v25 = vld [vmem:[%s1759_s5 + $0x8] sm:$0xff]  }
  0x5f   :  { %1317 = vmatprep.subr.bf16.mxu1 %v1547_v26  ;;  %v156_v5 = vrot.slane %v147_v2, %v155_v3  ;;  %v1561_v26 = vld [vmem:[%s1759_s5 + $0x10] sm:$0xff]  }
  0x60   :  { %781 = vmatpush1.bf16.msra.mxu0 %v1451_v6 }
  0x61   :  { %782 = vmatprep.subr.bf16.mxu0 %v1459_v7 }
  0x62   :  { %1318 = vmatpush3.bf16.msra.mxu1 %v1548_v29  ;;  %v1564_v29 = vld [vmem:[%s1759_s5 + $0x28] sm:$0xff]  }
  0x63   :  { %1319 = vmatprep.subr.bf16.mxu1 %v1549_v30  ;;  %v1565_v30 = vld [vmem:[%s1759_s5 + $0x30] sm:$0xff]  }
  0x64   :  { %783 = vmatpush1.bf16.msra.mxu0 %v1457_v8 }
  0x65   :  { %784 = vmatprep.subr.bf16.mxu0 %v1465_v11 }
  0x66   :  { %1320 = vmatpush3.bf16.msra.mxu1 %v1550_v33  ;;  %v1278_v33 = vld [vmem:[%s1758_s4] ss:$0 sm:$0xff] }
  0x67   :  { %1321 = vmatprep.subr.bf16.mxu1 %v1551_v34 }
  0x68   :  { %785 = vmatpush1.bf16.msra.mxu0 %v1463_v14 }
  0x69   :  { %786 = vmatprep.subr.bf16.mxu0 %v1471_v15 }
  0x6a   :  { %1322 = vmatpush3.bf16.msra.mxu1 %v1552_v51 }
  0x6b   :  { %1323 = vmatprep.subr.bf16.mxu1 %v1553_v52 }
  0x6c   :  { %787 = vmatpush1.bf16.msra.mxu0 %v1469_v18 }
  0x6d   :  { %788 = vmatprep.subr.bf16.mxu0 %v1477_v19 }
  0x6e   :  { %1324 = vmatpush3.bf16.msra.mxu1 %v1554_v53 }
  0x6f   :  { %1325 = vmatprep.subr.bf16.mxu1 %v1555_v54 }
  0x70   :  { %789 = vmatpush1.bf16.msra.mxu0 %v1475_v23 }
  0x71   :  { %790 = vmatprep.subr.bf16.mxu0 %v1483_v24  ;;  %v1559_v24 = vld [vmem:[%s1759_s5] sm:$0xff]  }
  0x72   :  { %1326 = vmatpush3.bf16.msra.mxu1 %v1556_v55 }
  0x73   :  { %1327 = vmatprep.subr.bf16.mxu1 %v1557_v56 }
  0x74   :  { %791 = vmatpush1.bf16.msra.mxu0 %v1481_v27  ;;  %v1562_v27 = vld [vmem:[%s1759_s5 + $0x18] sm:$0xff]  }
  0x75   :  { %792 = vmatprep.subr.bf16.mxu0 %v1489_v28  ;;  %v1563_v28 = vld [vmem:[%s1759_s5 + $0x20] sm:$0xff]  }
  0x76   :  { %1328 = vmatpush3.bf16.msra.mxu1 %v1558_v57 }
  0x77   :  { %1344 = vmatprep.subr.bf16.mxu1 %v1595_v58 }
  0x78   :  { %793 = vmatpush1.bf16.msra.mxu0 %v1487_v31  ;;  %v1566_v31 = vld [vmem:[%s1759_s5 + $0x38] sm:$0xff]  }
  0x79   :  { %794 = vmatprep.subr.bf16.mxu0 %v1495_v32 }
  0x7c   :  { %795 = vmatpush1.bf16.msra.mxu0 %v1493_v35 }
  0x7d   :  { %796 = vmatprep.subr.bf16.mxu0 %v1501_v36 }
  0x80   :  { %797 = vmatpush1.bf16.msra.mxu0 %v1499_v37 }
  0x81   :  { %798 = vmatprep.subr.bf16.mxu0 %v1507_v38 }
  0x84   :  { %799 = vmatpush1.bf16.msra.mxu0 %v1505_v39 }
  0x85   :  { %800 = vmatprep.subr.bf16.mxu0 %v1513_v40 }
  0x88   :  { %801 = vmatpush1.bf16.msra.mxu0 %v1511_v41 }
  0x89   :  { %802 = vmatprep.subr.bf16.mxu0 %v1519_v42 }
  0x8c   :  { %803 = vmatpush1.bf16.msra.mxu0 %v1517_v43 }
  0x8d   :  { %804 = vmatprep.subr.bf16.mxu0 %v1525_v44  ;;  %v1295_v44 = vld [vmem:[%s1760_s6] ss:$0 sm:$0xff] }
  0x90   :  { %805 = vmatpush1.bf16.msra.mxu0 %v1523_v45 }
  0x91   :  { %817 = vmatprep.subr.bf16.mxu0 %v1534_v46 }
  0x93   :  { %807 = vmatmul.mubr.bf16.vlgmr.msra.gmra.mrb[0].mxu0 %v1527_v47 }
  0x94   :  { %818 = vmatpush1.bf16.msra.mxu0 %v1532_v48  ;;  %849 = vmatprep.mubr.bf16.mxu0 %v1594_v49 }
  0x9f   :  { %1277 = vmatmul.mubr.msk.bf16.vlgmr.msra.gmra.mrb[0].mxu0 %vm684_vm0, %v1542_v50 }
 0x12c   :  { %v722_v59 = vpop.f32.mrb[0].mxu1 }
 0x12d   :  { %v724_v60 = vpop.f32.mrb[1].mxu1  ;;  %v723_v6 = vadd.f32 %v722_v59, %v152_v4 }
 0x12e   :  { %v726_v61 = vpop.f32.mrb[2].mxu1  ;;  %v725_v7 = vadd.f32 %v724_v60, %v156_v5 }
 0x12f   :  { %v728_v62 = vpop.f32.mrb[3].mxu1  ;;  %v727_v9 = vadd.f32 %v726_v61, %v152_v4 }
 0x130   :  { %v729_v12 = vadd.f32 %v728_v62, %v156_v5 }
 0x172   :  { %v851_v8 = vpop.f32.mrb[0].mxu0 }
 0x173   :  { %v1365_v10 = vadd.f32 %v851_v8, %v723_v6  ;;  %v853_v11 = vpop.f32.mrb[1].mxu0 }
 0x174   :  { %v1367_v13 = vadd.f32 %v853_v11, %v725_v7  ;;  %v855_v14 = vpop.f32.mrb[2].mxu0 }
 0x175   :  { %v1369_v15 = vadd.f32 %v855_v14, %v727_v9  ;;  %v857_v16 = vpop.f32.mrb[3].mxu0  ;;  %v860_v18 = vmax.f32 %v1365_v10, 0.0 }
 0x176   :  { %v1371_v17 = vadd.f32 %v857_v16, %v729_v12  ;;  %v861_v20 = vmax.f32 %v1367_v13, 0.0 }
 0x177   :  { %v862_v19 = vmax.f32 %v1369_v15, 0.0 }
 0x178   :  { %v863_v21 = vmax.f32 %v1371_v17, 0.0 }
 0x179   :  { %v864_v22 = vpack.c.bf16 %v862_v19, %v860_v18 }
 0x17a   :  { %v865_v23 = vpack.c.bf16 %v863_v21, %v861_v20 }
 0x17c   :  { %1033 = vmatprep.mubr.bf16.mxu1 %v865_v23 }
 0x17d   :  { %1034 = vmatmul.mubr.bf16.vlgmr.msra.gmra.mrb[4].mxu1 %v864_v22 }
 0x17e   :  { %1345 = vmatpush3.bf16.msra.mxu1 %v1559_v24  ;;  %1360 = vmatprep.mubr.msk.bf16.mxu1 %vm1596_vm1, %v1595_v58 }
 0x17f   :  { %1346 = vmatprep.subr.bf16.mxu1 %v1595_v58 }
 0x182   :  { %1347 = vmatpush3.bf16.msra.mxu1 %v1560_v25 }
 0x183   :  { %1348 = vmatprep.subr.bf16.mxu1 %v1595_v58 }
 0x186   :  { %1349 = vmatpush3.bf16.msra.mxu1 %v1561_v26 }
 0x187   :  { %1350 = vmatprep.subr.bf16.mxu1 %v1595_v58 }
 0x18a   :  { %1351 = vmatpush3.bf16.msra.mxu1 %v1562_v27 }
 0x18b   :  { %1352 = vmatprep.subr.bf16.mxu1 %v1595_v58 }
 0x18e   :  { %1353 = vmatpush3.bf16.msra.mxu1 %v1563_v28 }
 0x18f   :  { %1354 = vmatprep.subr.bf16.mxu1 %v1595_v58 }
 0x192   :  { %1355 = vmatpush3.bf16.msra.mxu1 %v1564_v29 }
 0x193   :  { %1356 = vmatprep.subr.bf16.mxu1 %v1595_v58 }
 0x196   :  { %1357 = vmatpush3.bf16.msra.mxu1 %v1565_v30 }
 0x197   :  { %1358 = vmatprep.subr.bf16.mxu1 %v1595_v58 }
 0x19a   :  { %1359 = vmatpush3.bf16.msra.mxu1 %v1566_v31 }
 0x250   :  { %v1329_v32 = vpop.f32.mrb[4].mxu1 }
 0x251   :  { %v1330_v34 = vpop.f32.mrb[5].mxu1 }
 0x252   :  { %v1331_v35 = vadd.f32 %v1330_v34, %v1329_v32  ;;  %v1332_v36 = vpop.f32.mrb[6].mxu1 }
 0x253   :  { %v1333_v37 = vpop.f32.mrb[7].mxu1 }
 0x254   :  { %v1036_v38 = vadd.f32 %v1331_v35, %v1278_v33  ;;  %v1334_v39 = vadd.f32 %v1333_v37, %v1332_v36 }
 0x256   :  { %v1039_v40 = vadd.f32 %v1334_v39, %v1278_v33  ;;  %v1042_v41 = vmax.f32 %v1036_v38, 0.0 }
 0x258   :  { %v1043_v42 = vmax.f32 %v1039_v40, 0.0 }
 0x25a   :  { %v1044_v43 = vpack.c.bf16 %v1043_v42, %v1042_v41 }
 0x25c   :  { %1361 = vmatmul.mubr.bf16.vlgmr.msra.gmra.mrb[8].mxu1 %v1044_v43 }
 0x32f   :  { %v1150_v45 = vpop.f32.mrb[8].mxu1 }
 0x330   :  { %v1362_v46 = vpop.f32.mrb[9].mxu1  ;;  %v1151_v48 = vadd.f32 %v1295_v44, %v1150_v45 }
 0x331   :  { %v1153_v47 = vpop.f32.mrb[10].mxu1 }
 0x332   :  { %v1154_v49 = vadd.f32 %v1295_v44, %v1153_v47  ;;  %v1363_v50 = vpop.f32.mrb[11].mxu1 }
 0x334   :  { %v1311_v51 = vpack.c.bf16 %v1154_v49, %v1151_v48 }
 0x336   :  { %1312 = vst [vmem:[%s1761_s7] sm:$0xff] %v1311_v51  }
 0x337   :  { %1171 = vsyncpa [#allocation3], 1 }

</bundles_post_ra>
